<compile_context>
chip_gen: v7x
topology: tpu7x:2x2x1
jax: 0.10.0
libtpu: 0.0.40
codegen_flags: <defaults>
</compile_context>

<pallas_src>
import functools

import numpy as np

import jax
import jax.numpy as jnp
from jax.experimental import pallas as pl
from jax.experimental.pallas import tpu as pltpu

NEG = -1e30


# ----------------------------- fused QKV projection --------------------------
def _qkv_proj_kernel(x_ref, w_ref, b_ref, o_ref):
    # x: [TM, H], w: [H, 3H] (resident), b: [1, 3H]
    acc = jnp.dot(x_ref[...], w_ref[...], preferred_element_type=jnp.float32)
    o_ref[...] = (acc + b_ref[...]).astype(o_ref.dtype)


def fused_qkv_projection(x2d, w_qkv, b_qkv, *, tile_m=256):
    """y = x2d @ w_qkv + b_qkv, row-tiled; weights/bias stay resident."""
    M, H = x2d.shape
    N = w_qkv.shape[1]
    tm = min(tile_m, M)
    if tm != M and tm % 8 != 0:   # keep (8,128) block constraint satisfied
        tm = M
    return pl.pallas_call(
        _qkv_proj_kernel,
        out_shape=jax.ShapeDtypeStruct((M, N), x2d.dtype),
        grid=(pl.cdiv(M, tm),),
        in_specs=[
            pl.BlockSpec((tm, H), lambda i: (i, 0)),
            pl.BlockSpec((H, N), lambda i: (0, 0)),
            pl.BlockSpec((1, N), lambda i: (0, 0)),
        ],
        out_specs=pl.BlockSpec((tm, N), lambda i: (i, 0)),
        compiler_params=pltpu.CompilerParams(dimension_semantics=("parallel",)),
    )(x2d, w_qkv, b_qkv.reshape(1, N))


# ----------------------------- log-sparse KV-tile schedule --------------------
def _build_kv_schedule(T, tq, tk):
    """For each q tile, the list of KV tiles that contain at least one allowed
    (query, key) pair (delta == 0 or delta == 2^k). Padded to max_live."""
    nq = -(-T // tq)
    deltas = [0]
    p = 1
    while p <= T - 1:
        deltas.append(p)
        p *= 2
    live = []
    for qi in range(nq):
        q_lo = qi * tq
        q_hi = min((qi + 1) * tq, T) - 1
        tiles = set()
        for d_ in deltas:
            k_hi = q_hi - d_
            if k_hi < 0:
                continue
            k_lo = max(q_lo - d_, 0)
            for t in range(k_lo // tk, k_hi // tk + 1):
                tiles.add(t)
        live.append(sorted(tiles))
    max_live = max(len(x) for x in live)
    tab = np.zeros((nq, max_live), dtype=np.int32)
    num = np.zeros((nq,), dtype=np.int32)
    for qi, tiles in enumerate(live):
        num[qi] = len(tiles)
        for j in range(max_live):
            tab[qi, j] = tiles[min(j, len(tiles) - 1)]   # pad with last valid
    return jnp.asarray(tab), jnp.asarray(num), max_live


# ----------------------------- flash log-sparse attention ---------------------
def _flash_logsparse_kernel(kv_tab_ref, kv_num_ref,
                            q_ref, k_ref, v_ref, amask_ref,
                            o_ref, m_sc, l_sc, acc_sc, *, tq, tk, scale):
    qi = pl.program_id(1)
    ki = pl.program_id(2)

    @pl.when(ki == 0)
    def _():
        m_sc[...] = jnp.full_like(m_sc, NEG)
        l_sc[...] = jnp.zeros_like(l_sc)
        acc_sc[...] = jnp.zeros_like(acc_sc)

    @pl.when(ki < kv_num_ref[qi])          # skip padded (dead) KV steps
    def _():
        q = q_ref[...] * scale             # fold 1/sqrt(d) into q tile
        s = jnp.dot(q, k_ref[...].T, preferred_element_type=jnp.float32)

        # Per-tile causal + log-sparse mask (delta == 0 or positive power of 2).
        kv_tile = kv_tab_ref[qi, ki]
        row = qi * tq + jax.lax.broadcasted_iota(jnp.int32, (tq, tk), 0)
        col = kv_tile * tk + jax.lax.broadcasted_iota(jnp.int32, (tq, tk), 1)
        delta = row - col
        allowed = (delta == 0) | ((delta > 0)
                                  & (jnp.bitwise_and(delta, delta - 1) == 0))

        # Additive attention mask only matters on allowed entries.
        s = jnp.where(allowed, s + amask_ref[...], NEG)

        # Online softmax update (statistics kept in f32).
        m_prev = m_sc[...]
        m_new = jnp.maximum(m_prev, jnp.max(s, axis=-1, keepdims=True))
        alpha = jnp.exp(m_prev - m_new)
        p = jnp.exp(s - m_new)
        l_sc[...] = alpha * l_sc[...] + jnp.sum(p, axis=-1, keepdims=True)
        acc_sc[...] = alpha * acc_sc[...] + jnp.dot(
            p.astype(v_ref.dtype), v_ref[...], preferred_element_type=jnp.float32)
        m_sc[...] = m_new

    @pl.when(ki == pl.num_programs(2) - 1)
    def _():
        # TODO(synk): attention-prob dropout skipped (eval-mode identity).
        inv_l = pl.reciprocal(l_sc[...], approx=True)
        o_ref[...] = (acc_sc[...] * inv_l).astype(o_ref.dtype)


def _flash_logsparse_attention(q, k, v, amask, *, num_heads, tq, tk,
                               kv_tab, kv_num, max_live):
    """q/k/v: [B*heads, T, d]; amask: [B, 1, T] additive."""
    BH, T, d = q.shape
    nq = pl.cdiv(T, tq)
    nH = num_heads
    kern = functools.partial(_flash_logsparse_kernel, tq=tq, tk=tk,
                             scale=float(d) ** -0.5)
    return pl.pallas_call(
        kern,
        out_shape=jax.ShapeDtypeStruct((BH, T, d), q.dtype),
        grid_spec=pltpu.PrefetchScalarGridSpec(
            num_scalar_prefetch=2,
            grid=(BH, nq, max_live),
            in_specs=[
                pl.BlockSpec((None, tq, d),
                             lambda bh, qi, ki, tab, num: (bh, qi, 0)),
                pl.BlockSpec((None, tk, d),
                             lambda bh, qi, ki, tab, num: (bh, tab[qi, ki], 0)),
                pl.BlockSpec((None, tk, d),
                             lambda bh, qi, ki, tab, num: (bh, tab[qi, ki], 0)),
                pl.BlockSpec((None, 1, tk),
                             lambda bh, qi, ki, tab, num: (bh // nH, 0,
                                                           tab[qi, ki])),
            ],
            out_specs=pl.BlockSpec((None, tq, d),
                                   lambda bh, qi, ki, tab, num: (bh, qi, 0)),
            scratch_shapes=[
                pltpu.VMEM((tq, 1), jnp.float32),   # running max m
                pltpu.VMEM((tq, 1), jnp.float32),   # running denom l
                pltpu.VMEM((tq, d), jnp.float32),   # output accumulator
            ],
        ),
        compiler_params=pltpu.CompilerParams(
            dimension_semantics=("parallel", "parallel", "arbitrary")),
    )(kv_tab, kv_num, q, k, v, amask)


# ----------------------------- full forward ----------------------------------
def prepare_params(params):
    """One-time: transpose + concat projection weights (no per-call .T)."""
    w_qkv = jnp.concatenate(
        [params["query_w"].T, params["key_w"].T, params["value_w"].T], axis=1)
    b_qkv = jnp.concatenate(
        [params["query_b"], params["key_b"], params["value_b"]], axis=0)
    return w_qkv, b_qkv


def log_sparse_attention_forward(hidden_states, attention_mask, w_qkv, b_qkv,
                                 num_heads):
    B, T, H = hidden_states.shape
    d = H // num_heads

    # Fused QKV projection: activations read once, one wide matmul.
    x2d = hidden_states.reshape(B * T, H)
    qkv = fused_qkv_projection(x2d, w_qkv, b_qkv)               # [B*T, 3H]
    qkv = qkv.reshape(B, T, 3, num_heads, d).transpose(2, 0, 3, 1, 4)
    qkv = qkv.reshape(3, B * num_heads, T, d)
    q, k, v = qkv[0], qkv[1], qkv[2]

    amask = attention_mask.reshape(B, 1, T)

    # Tile plan: 128x128 tiles fit comfortably on v5e/v6e/v7x VMEM budgets.
    tq = T if T < 128 else 128
    tk = T if T < 128 else 128
    kv_tab, kv_num, max_live = _build_kv_schedule(T, tq, tk)

    out = _flash_logsparse_attention(
        q, k, v, amask, num_heads=num_heads, tq=tq, tk=tk,
        kv_tab=kv_tab, kv_num=kv_num, max_live=max_live)        # [B*h, T, d]

    return out.reshape(B, num_heads, T, d).transpose(0, 2, 1, 3).reshape(B, T, H)


# ----------------------------- pure-JAX reference -----------------------------
def _reference_forward(hidden_states, attention_mask, params, num_heads):
    B, T, H = hidden_states.shape
    d = H // num_heads

    def proj(name):
        y = hidden_states @ params[name + "_w"].T + params[name + "_b"]
        return y.reshape(B, T, num_heads, d).transpose(0, 2, 1, 3)

    q, k, v = proj("query"), proj("key"), proj("value")
    scores = jnp.einsum("bhqd,bhkd->bhqk", q, k) * (d ** -0.5)
    idx = jnp.arange(T)
    delta = idx[:, None] - idx[None, :]
    allowed = (delta == 0) | ((delta > 0) & ((delta & (delta - 1)) == 0))
    scores = jnp.where(allowed[None, None], scores, -jnp.inf)
    scores = scores + attention_mask
    probs = jax.nn.softmax(scores, axis=-1)
    out = jnp.einsum("bhqk,bhkd->bhqd", probs, v)
    return out.transpose(0, 2, 1, 3).reshape(B, T, H)


# ----------------------------- main -------------------------------------------
if __name__ == "__main__":
    B, T, H, NUM_HEADS = 2, 8, 32, 4

    key = jax.random.PRNGKey(0)
    k_x, k_m, k_qw, k_qb, k_kw, k_kb, k_vw, k_vb = jax.random.split(key, 8)

    hidden_states = jax.random.normal(k_x, (B, T, H), dtype=jnp.float32)
    # Additive attention mask [B, 1, 1, T] (small finite values).
    attention_mask = 0.1 * jax.random.normal(k_m, (B, 1, 1, T), dtype=jnp.float32)

    params = {
        "query_w": 0.02 * jax.random.normal(k_qw, (H, H), dtype=jnp.float32),
        "query_b": 0.02 * jax.random.normal(k_qb, (H,), dtype=jnp.float32),
        "key_w": 0.02 * jax.random.normal(k_kw, (H, H), dtype=jnp.float32),
        "key_b": 0.02 * jax.random.normal(k_kb, (H,), dtype=jnp.float32),
        "value_w": 0.02 * jax.random.normal(k_vw, (H, H), dtype=jnp.float32),
        "value_b": 0.02 * jax.random.normal(k_vb, (H,), dtype=jnp.float32),
    }

    w_qkv, b_qkv = prepare_params(params)

    out = log_sparse_attention_forward(hidden_states, attention_mask,
                                       w_qkv, b_qkv, NUM_HEADS)
    out = jax.block_until_ready(out)

    ref = _reference_forward(hidden_states, attention_mask, params, NUM_HEADS)
    assert out.shape == (B, T, H)
    assert jnp.allclose(out, ref, atol=2e-3, rtol=2e-3), "mismatch vs reference"

    print("KERNEL_OK")
</pallas_src>

<mosaic_0001>
module attributes {stable_mosaic.version = 11 : i64} {
  func.func @_qkv_proj_kernel(%arg0: i32, %arg1: memref<16x32xf32, #tpu.memory_space<vmem>>, %arg2: memref<32x96xf32, #tpu.memory_space<vmem>>, %arg3: memref<1x96xf32, #tpu.memory_space<vmem>>, %arg4: memref<16x96xf32, #tpu.memory_space<vmem>>) attributes {dimension_semantics = [#tpu.dimension_semantics<parallel>], iteration_bounds = array<i64: 1>, scalar_prefetch = 0 : i64, scratch_operands = 0 : i64, tpu.core_type = #tpu.core_type<tc>, window_params = [{transform_indices = @transform_0, window_bounds = array<i64: 16, 32>}, {pipeline_mode = #tpu.pipeline_mode<synchronous>, transform_indices = @transform_1, window_bounds = array<i64: 32, 96>}, {pipeline_mode = #tpu.pipeline_mode<synchronous>, transform_indices = @transform_2, window_bounds = array<i64: 1, 96>}, {transform_indices = @transform_3, window_bounds = array<i64: 16, 96>}]} {
    %c0 = arith.constant 0 : index
    %c0_0 = arith.constant 0 : index
    %0 = vector.load %arg1[%c0, %c0_0] : memref<16x32xf32, #tpu.memory_space<vmem>>, vector<16x32xf32>
    %c0_1 = arith.constant 0 : index
    %c0_2 = arith.constant 0 : index
    %1 = vector.load %arg2[%c0_1, %c0_2] : memref<32x96xf32, #tpu.memory_space<vmem>>, vector<32x96xf32>
    %cst = arith.constant dense<0.000000e+00> : vector<16x96xf32>
    %2 = tpu.matmul %0, %1, %cst {dimension_numbers = #tpu.dot_dimension_numbers<[1], [0], [0], [1], [0, 0, 1, 1], [], []>} : vector<16x32xf32>, vector<32x96xf32>, vector<16x96xf32> -> vector<16x96xf32>
    %c0_3 = arith.constant 0 : index
    %c0_4 = arith.constant 0 : index
    %3 = vector.load %arg3[%c0_3, %c0_4] : memref<1x96xf32, #tpu.memory_space<vmem>>, vector<1x96xf32>
    %4 = vector.broadcast %3 : vector<1x96xf32> to vector<16x96xf32>
    %5 = arith.addf %2, %4 : vector<16x96xf32>
    %c0_5 = arith.constant 0 : index
    %c0_6 = arith.constant 0 : index
    %6 = vector.load %arg4[%c0_5, %c0_6] : memref<16x96xf32, #tpu.memory_space<vmem>>, vector<16x96xf32>
    tpu.vector_store %arg4[%c0_5, %c0_6], %5 {strides = array<i32>} : memref<16x96xf32, #tpu.memory_space<vmem>>, vector<16x96xf32>,
    return
  }
  func.func @transform_0(%arg0: i32) -> (i32, i32) {
    %c0_i32 = arith.constant 0 : i32
    %c0_i32_0 = arith.constant 0 : i32
    return %arg0, %c0_i32 : i32, i32
  }
  func.func @transform_1(%arg0: i32) -> (i32, i32) {
    %c0_i32 = arith.constant 0 : i32
    %c0_i32_0 = arith.constant 0 : i32
    %c0_i32_1 = arith.constant 0 : i32
    return %c0_i32, %c0_i32_0 : i32, i32
  }
  func.func @transform_2(%arg0: i32) -> (i32, i32) {
    %c0_i32 = arith.constant 0 : i32
    %c0_i32_0 = arith.constant 0 : i32
    %c0_i32_1 = arith.constant 0 : i32
    return %c0_i32, %c0_i32_0 : i32, i32
  }
  func.func @transform_3(%arg0: i32) -> (i32, i32) {
    %c0_i32 = arith.constant 0 : i32
    %c0_i32_0 = arith.constant 0 : i32
    return %arg0, %c0_i32 : i32, i32
  }
}

</mosaic_0001>

<bundles_post_ra>
// kernel: tpu_custom_call.1
= control target key start
LH: loop header
LB: loop body
LE: loop exit
PB: predicated region body
PF: predicated region fallthrough
CT: control target
= control target key end

     0   :  { %8 = vsyncpa [#allocation3], 0  ;;  %s337_s0 = inlined_call_operand.hbm [shape: f32[16,32], index: 0, kind: input, shape index: {}]   ;;  %s338_s1 = inlined_call_operand.hbm [shape: f32[32,96], index: 1, kind: input, shape index: {}]   ;;  %s339_s2 = inlined_call_operand.vmem [shape: f32[1,96], index: 2, kind: input, shape index: {}]   ;;  %s340_s3 = inlined_call_operand.hbm [shape: f32[16,96], index: 3, kind: output, shape index: {}]  }
   0x1   :  { %9 = vsyncpa [#allocation6], 0 }
   0x2   :  { %10 = vsyncpa [#allocation4], 0  ;;  %s264_s12 = smov [#allocation2]   ;;  %s192_s16 = scalar_lea.hbm %s337_s0, 256 }
   0x3   :  { %s16_s13 = sshll.u32 %s264_s12, 4  ;;  %p193_p0 = scmp.ne.s32.totalorder %s337_s0, %s192_s16  ;;  %s17_s13 = int_to_ptr.vmem [resolvable:$true] %s16_s13 }
   0x4   :  { %p196_p1 = scmp.lt.u32.totalorder %s192_s16, %s337_s0 }
   0x6   :  { %p198_p2 = pnand %p196_p1, %p193_p0 }
   0x8   :  { %201 = shalt.err (!%p198_p2)
}
   0x9   :  { %s202_s21 = scalar_lea.vmem %s17_s13, 256  ;;  %p207_p4 = scmp.lt.s32.totalorder %s17_s13, %s17_s13 }
   0xa   :  { %p203_p3 = scmp.ne.s32.totalorder %s17_s13, %s202_s21  ;;  %p208_p5 = scmp.lt.s32.totalorder %s202_s21, %s202_s21 }
   0xc   :  { %p209_p6 = por %p208_p5, %p207_p4 }
   0xe   :  { %p210_p7 = pnand %p209_p6, %p203_p3 }
  0x10   :  { %213 = shalt.err (!%p210_p7)
}
  0x11   :  { %s265_s22 = smov 128   ;;  %s266_s23 = smov 8  }
  0x12   :  { %22 = dma.hbm_to_vmem [thread:$0]  %s337_s0, 256, %s17_s13, [#allocation3], %s265_s22, %s265_s22, %s266_s23  }
  0x13   :  { %s267_s26 = smov [#allocation5]   ;;  %s214_s30 = scalar_lea.hbm %s338_s1, 512 }
  0x14   :  { %s28_s27 = sshll.u32 %s267_s26, 4  ;;  %p215_p8 = scmp.ne.s32.totalorder %s338_s1, %s214_s30  ;;  %s29_s27 = int_to_ptr.vmem [resolvable:$true] %s28_s27 }
  0x15   :  { %p218_p9 = scmp.lt.u32.totalorder %s214_s30, %s338_s1 }
  0x17   :  { %p220_p10 = pnand %p218_p9, %p215_p8 }
  0x19   :  { %223 = shalt.err (!%p220_p10)
}
  0x1a   :  { %s224_s8 = scalar_lea.vmem %s29_s27, 512  ;;  %p229_p12 = scmp.lt.s32.totalorder %s29_s27, %s29_s27 }
  0x1b   :  { %p225_p11 = scmp.ne.s32.totalorder %s29_s27, %s224_s8  ;;  %p230_p13 = scmp.lt.s32.totalorder %s224_s8, %s224_s8 }
  0x1d   :  { %p231_p0 = por %p230_p13, %p229_p12 }
  0x1f   :  { %p232_p1 = pnand %p231_p0, %p225_p11 }
  0x21   :  { %235 = shalt.err (!%p232_p1)
}
  0x22   :  { %34 = dma.hbm_to_vmem [thread:$0]  %s338_s1, 512, %s29_s27, [#allocation6], %s265_s22, %s265_s22, %s266_s23  }
  0x23   :  { %258 = dma.done.wait [#allocation3], 256  }
  0x24   :  { %259 = vsyncadd [#allocation3], 4294967040 }
  0x25   :  { %260 = dma.done.wait [#allocation6], 512  }
  0x26   :  { %261 = vsyncadd [#allocation6], 4294966784  ;;  %vm56_vm0 = vcmask 261120   ;;  %v45_v0 = vld [vmem:[#allocation5] sm:$0xff]  ;;  %v46_v1 = vld [vmem:[#allocation5 + $0x8] sm:$0xff]  ;;  %s268_s11 = smov [#allocation7]  }
  0x27   :  { %v47_v2 = vld [vmem:[#allocation5 + $0x10] sm:$0xff]  ;;  %v179_v3 = vpack.c.bf16 %v46_v1, %v45_v0  ;;  %v48_v4 = vld [vmem:[#allocation5 + $0x18] sm:$0xff]  ;;  %s146_s12 = sshll.u32 %s268_s11, 4  ;;  %vm138_vm1 = vcmask 785408   ;;  %s147_s12 = int_to_ptr.vmem [resolvable:$true] %s146_s12 }
  0x28   :  { %v43_v5 = vld [vmem:[#allocation2] sm:$0xff]  ;;  %v183_v6 = vpack.c.bf16 %v48_v4, %v47_v2  ;;  %v44_v7 = vld [vmem:[#allocation2 + $0x8] sm:$0xff]  ;;  %s236_s13 = scalar_lea.vmem %s147_s12, 256  ;;  %p241_p3 = scmp.lt.s32.totalorder %s147_s12, %s147_s12 }
  0x29   :  { %176 = vmatprep.mubr.msk.f32.mxu0 %vm56_vm0, %v43_v5  ;;  %180 = vmatprep.subr.bf16.mxu0 %v179_v3  ;;  %v159_v8 = vld [vmem:[%s339_s2] ss:$0 sm:$0xff]  ;;  %p237_p2 = scmp.ne.s32.totalorder %s147_s12, %s236_s13  ;;  %p242_p4 = scmp.lt.s32.totalorder %s236_s13, %s236_s13 }
  0x2a   :  { %182 = vmatpush3.bf16.msra.mxu0 %v179_v3 }
  0x2b   :  { %184 = vmatprep.subr.bf16.mxu0 %v183_v6  ;;  %p243_p5 = por %p242_p4, %p241_p3 }
  0x2d   :  { %p244_p6 = pnand %p243_p5, %p237_p2 }
  0x2e   :  { %186 = vmatpush3.bf16.msra.mxu0 %v183_v6 }
  0x31   :  { %177 = vmatmul.mubr.msk.f32.vlgmr.msra.gmra.mrb[0].mxu0 %vm56_vm0, %v44_v7 }
 0x104   :  { %v178_v9 = vpop.f32.mrb[0].mxu0 }
 0x105   :  { %v135_v10 = vadd.f32 %v178_v9, %v159_v8  ;;  %v129_v11 = vpop.f32.mrb[1].mxu0 }
 0x106   :  { %v130_v12 = vadd.f32 %v159_v8, %v129_v11 }
 0x107   :  { %140 = vst.msk [vmem:[#allocation7 + $0x8] sm:$0xff] %vm138_vm1, %v135_v10 }
 0x108   :  { %139 = vst.msk [vmem:[#allocation7] sm:$0xff] %vm138_vm1, %v130_v12 }
 0x109   :  { %247 = shalt.err (!%p244_p6)
}
 0x10a   :  { %s248_s2 = scalar_lea.hbm %s340_s3, 256 }
 0x10b   :  { %p249_p7 = scmp.ne.s32.totalorder %s340_s3, %s248_s2  ;;  %p252_p8 = scmp.lt.u32.totalorder %s248_s2, %s340_s3 }
 0x10d   :  { %p254_p9 = pnand %p252_p8, %p249_p7 }
 0x10f   :  { %257 = shalt.err (!%p254_p9)
}
 0x110   :  { %152 = dma.vmem_to_hbm [thread:$0]  %s147_s12, 256, %s340_s3, [#allocation4], %s265_s22, %s265_s22, %s266_s23  }
 0x111   :  { %262 = dma.done.wait [#allocation4], 256  }
 0x112   :  { %263 = vsyncadd [#allocation4], 4294967040 }
 0x113   :  { %156 = vsyncpa [#allocation3], 1 }
 0x114   :  { %157 = vsyncpa [#allocation6], 1 }
 0x115   :  { %158 = vsyncpa [#allocation4], 1 }

</bundles_post_ra>
